<compile_context>
chip_gen: v6e
topology: v6e:2x2x1
jax: 0.10.0
libtpu: 0.0.40
codegen_flags: <defaults>
</compile_context>

<pallas_src>
import jax
import jax.numpy as jnp
from jax import lax
from jax.experimental import pallas as pl
from jax.experimental.pallas import tpu as pltpu

_LANE = 128
_SUBLANE = 8
_INV_SQRT2 = 0.7071067811865476


def _round_up(x, m):
    return (x + m - 1) // m * m


def _vmem_capacity_bytes():
    try:
        return int(pltpu.get_tpu_info().vmem_capacity_bytes)
    except Exception:
        return 64 * 1024 * 1024  # conservative fallback: v7x per-TensorCore VMEM


def _gelu_erf(y):
    # nn.GELU() default = exact erf formulation.
    # NOTE: erf lowers to a VALU polynomial (not an EUP op); in this kernel's
    # regime it hides under the MXU / HBM streams, so we keep exact semantics.
    return 0.5 * y * (1.0 + lax.erf(y * jnp.float32(_INV_SQRT2)))


# --------------------------- kernels -----------------------------------------

def _kernel_resident(x_ref, w_ref, b_ref, o_ref):
    # Whole (padded) feature dim in one tile; bf16 W and f32 bias stay VMEM-resident.
    x = x_ref[...]                                               # (tm, P) caller dtype
    y = jnp.dot(x.astype(jnp.bfloat16), w_ref[...],
                preferred_element_type=jnp.float32) + b_ref[...]  # MXU, f32 accumulate
    o_ref[...] = (x.astype(jnp.float32) + _gelu_erf(y)).astype(o_ref.dtype)


def _kernel_ntiled(xk_ref, xr_ref, w_ref, b_ref, o_ref):
    # N-tiled: full-width x tile feeds the K reduction (resident across j),
    # a narrow (tm, tn) x tile supplies the residual for this output block.
    y = jnp.dot(xk_ref[...].astype(jnp.bfloat16), w_ref[...],
                preferred_element_type=jnp.float32) + b_ref[...]
    o_ref[...] = (xr_ref[...].astype(jnp.float32) + _gelu_erf(y)).astype(o_ref.dtype)


# --------------------------- tile planning -----------------------------------

def _plan_feature(size, vmem_cap):
    """Pick padded width P and output-column tile tn from the VMEM budget."""
    budget = int(vmem_cap * 0.70)
    w_budget = budget // 2
    P = _round_up(size, _LANE)
    if P * P * 2 <= w_budget:                 # whole bf16 W fits -> keep it resident
        return P, P, 1
    # Tile N: double-buffered (P, tn) bf16 W blocks must fit in w_budget.
    m = P // _LANE
    d_max = max(1, (w_budget // (4 * P)) // _LANE)
    d = 1
    for cand in range(min(d_max, m), 0, -1):  # largest 128-multiple divisor of P
        if m % cand == 0:
            d = cand
            break
    tn = d * _LANE
    return P, tn, P // tn


def _plan_rows(n, P, tn, n_cols, x_bytes, out_bytes, vmem_cap):
    """Pick the row tile tm from what is left of the VMEM budget."""
    budget = int(vmem_cap * 0.70)
    if n_cols == 1:
        w_foot = P * tn * 2 + tn * 4                       # single-buffered W + bias
        per_row = 2 * (P * x_bytes + tn * out_bytes)       # 2x x tile + 2x out tile
    else:
        w_foot = 2 * (P * tn * 2 + tn * 4)                 # double-buffered W blocks
        per_row = 2 * (P * x_bytes + tn * x_bytes + tn * out_bytes)
    left = max(budget - w_foot, per_row * _SUBLANE)
    tm_fit = max(_SUBLANE, (left // per_row) // _SUBLANE * _SUBLANE)
    # Keep >= 2 row tiles when possible so the "parallel" row axis can split
    # across v7x's two TensorCores; cap at 1024 rows per tile.
    tm = min(1024, tm_fit, _round_up(max(pl.cdiv(n, 2), 1), _SUBLANE))
    return max(tm, _SUBLANE)


# --------------------------- forward ------------------------------------------

def _block_forward(x, w_t, b_p, *, size, P, tn, n_cols, vmem_cap):
    n = x.shape[0]
    x_bytes = jnp.dtype(x.dtype).itemsize
    out_bytes = x_bytes
    tm = _plan_rows(n, P, tn, n_cols, x_bytes, out_bytes, vmem_cap)
    n_pad = _round_up(n, tm)
    rows = n_pad // tm

    # Pad activations only when the shape actually needs it; padded rows/cols
    # are zero and sliced off afterwards.
    if n_pad != n or P != size:
        x_in = jnp.zeros((n_pad, P), x.dtype).at[:n, :size].set(x)
    else:
        x_in = x

    vmem_limit = min(int(vmem_cap * 0.85), 128 * 1024 * 1024)
    cost = pl.CostEstimate(
        flops=2 * n_pad * P * P,
        transcendentals=n_pad * P,
        bytes_accessed=(x_in.size * x_bytes + w_t.size * 2 + b_p.size * 4
                        + n_pad * P * out_bytes),
    )
    out_shape = jax.ShapeDtypeStruct((n_pad, P), x.dtype)

    if n_cols == 1:
        def call(single_buffer_w):
            pm = {"pipeline_mode": pl.Buffered(1)} if single_buffer_w else {}
            return pl.pallas_call(
                _kernel_resident,
                out_shape=out_shape,
                grid_spec=pl.GridSpec(
                    grid=(rows,),
                    in_specs=[
                        pl.BlockSpec((tm, P), lambda i: (i, 0)),       # x: pipelined row tiles
                        pl.BlockSpec((P, P), lambda i: (0, 0), **pm),  # W: grid-invariant
                        pl.BlockSpec((1, P), lambda i: (0, 0), **pm),  # bias: grid-invariant
                    ],
                    out_specs=pl.BlockSpec((tm, P), lambda i: (i, 0)),
                ),
                compiler_params=pltpu.CompilerParams(
                    dimension_semantics=("parallel",),
                    vmem_limit_bytes=vmem_limit,
                ),
                cost_estimate=cost,
            )(x_in, w_t, b_p)
        try:
            out_p = call(True)    # single-buffer the invariant W / bias (saves W-sized VMEM)
        except Exception:
            out_p = call(False)   # fallback if this jax rejects pipeline_mode=Buffered(1)
    else:
        out_p = pl.pallas_call(
            _kernel_ntiled,
            out_shape=out_shape,
            grid_spec=pl.GridSpec(
                grid=(rows, n_cols),
                in_specs=[
                    pl.BlockSpec((tm, P), lambda i, j: (i, 0)),    # x (K): resident across j
                    pl.BlockSpec((tm, tn), lambda i, j: (i, j)),   # x residual tile
                    pl.BlockSpec((P, tn), lambda i, j: (0, j)),    # W column block
                    pl.BlockSpec((1, tn), lambda i, j: (0, j)),    # bias block
                ],
                out_specs=pl.BlockSpec((tm, tn), lambda i, j: (i, j)),
            ),
            compiler_params=pltpu.CompilerParams(
                dimension_semantics=("parallel", "arbitrary"),
                vmem_limit_bytes=vmem_limit,
            ),
            cost_estimate=cost,
        )(x_in, x_in, w_t, b_p)

    if n_pad != n or P != size:
        out_p = out_p[:n, :size]
    return out_p


def make_block(weight, bias):
    """One-time parameter prep (transpose, zero-pad, bf16 cast) -> forward callable.

    weight: (size, size) in PyTorch nn.Linear layout (out_features, in_features)
    bias:   (size,)
    """
    size = weight.shape[0]
    vmem_cap = _vmem_capacity_bytes()
    P, tn, n_cols = _plan_feature(size, vmem_cap)

    # Hoisted out of the per-call path: build the padded (in, out)-layout bf16
    # weight and padded f32 bias exactly once.
    w_t = (jnp.zeros((P, P), jnp.float32)
           .at[:size, :size].set(jnp.asarray(weight, jnp.float32).T)
           .astype(jnp.bfloat16))
    b_p = jnp.zeros((1, P), jnp.float32).at[0, :size].set(jnp.asarray(bias, jnp.float32))

    def forward(x):
        return _block_forward(x, w_t, b_p, size=size, P=P, tn=tn,
                              n_cols=n_cols, vmem_cap=vmem_cap)
    return forward


if __name__ == "__main__":
    size = 32
    batch = 8

    key = jax.random.PRNGKey(0)
    kx, kw, kb = jax.random.split(key, 3)

    # Deterministic PyTorch-Linear-style uniform init.
    bound = 1.0 / jnp.sqrt(jnp.float32(size))
    weight = jax.random.uniform(kw, (size, size), jnp.float32, -bound, bound)  # (out, in)
    bias = jax.random.uniform(kb, (size,), jnp.float32, -bound, bound)
    x = jax.random.normal(kx, (batch, size), jnp.float32)

    block = make_block(weight, bias)   # one-time param prep
    out = block(x)
    jax.block_until_ready(out)

    # Pure-JAX reference (exact erf GELU, like nn.GELU()).
    y_ref = x @ weight.T + bias
    ref = x + jax.nn.gelu(y_ref, approximate=False)
    # bf16 MXU inputs -> intentionally relaxed tolerance (precision trade, not a bug).
    assert out.shape == x.shape
    assert jnp.allclose(out, ref, atol=3e-2, rtol=3e-2), "mismatch vs reference"

    print("KERNEL_OK")
</pallas_src>

<mosaic_0001>
module attributes {stable_mosaic.version = 11 : i64} {
  func.func @_kernel_resident(%arg0: i32, %arg1: memref<8x128xf32, #tpu.memory_space<vmem>>, %arg2: memref<128x128xbf16, #tpu.memory_space<vmem>>, %arg3: memref<1x128xf32, #tpu.memory_space<vmem>>, %arg4: memref<8x128xf32, #tpu.memory_space<vmem>>) attributes {dimension_semantics = [#tpu.dimension_semantics<parallel>], iteration_bounds = array<i64: 1>, scalar_prefetch = 0 : i64, scratch_operands = 0 : i64, tpu.core_type = #tpu.core_type<tc>, window_params = [{transform_indices = @transform_0, window_bounds = array<i64: 8, 128>}, {pipeline_mode = #tpu.pipeline_mode<synchronous>, transform_indices = @transform_1, window_bounds = array<i64: 128, 128>}, {pipeline_mode = #tpu.pipeline_mode<synchronous>, transform_indices = @transform_2, window_bounds = array<i64: 1, 128>}, {transform_indices = @transform_3, window_bounds = array<i64: 8, 128>}]} {
    %c0 = arith.constant 0 : index
    %c0_0 = arith.constant 0 : index
    %0 = vector.load %arg1[%c0, %c0_0] : memref<8x128xf32, #tpu.memory_space<vmem>>, vector<8x128xf32>
    %1 = arith.truncf %0 : vector<8x128xf32> to vector<8x128xbf16>
    %c0_1 = arith.constant 0 : index
    %c0_2 = arith.constant 0 : index
    %2 = vector.load %arg2[%c0_1, %c0_2] : memref<128x128xbf16, #tpu.memory_space<vmem>>, vector<128x128xbf16>
    %cst = arith.constant dense<0.000000e+00> : vector<8x128xf32>
    %3 = tpu.matmul %1, %2, %cst {dimension_numbers = #tpu.dot_dimension_numbers<[1], [0], [0], [1], [0, 0, 1, 1], [], []>} : vector<8x128xbf16>, vector<128x128xbf16>, vector<8x128xf32> -> vector<8x128xf32>
    %c0_3 = arith.constant 0 : index
    %c0_4 = arith.constant 0 : index
    %4 = vector.load %arg3[%c0_3, %c0_4] : memref<1x128xf32, #tpu.memory_space<vmem>>, vector<1x128xf32>
    %5 = vector.broadcast %4 : vector<1x128xf32> to vector<8x128xf32>
    %6 = arith.addf %3, %5 : vector<8x128xf32>
    %cst_5 = arith.constant 5.000000e-01 : f32
    %7 = vector.broadcast %cst_5 : f32 to vector<8x128xf32>
    %8 = arith.mulf %7, %6 : vector<8x128xf32>
    %cst_6 = arith.constant 0.707106769 : f32
    %9 = vector.broadcast %cst_6 : f32 to vector<8x128xf32>
    %10 = arith.mulf %6, %9 : vector<8x128xf32>
    %11 = math.erf %10 : vector<8x128xf32>
    %cst_7 = arith.constant 1.000000e+00 : f32
    %12 = vector.broadcast %cst_7 : f32 to vector<8x128xf32>
    %13 = arith.addf %12, %11 : vector<8x128xf32>
    %14 = arith.mulf %8, %13 : vector<8x128xf32>
    %15 = arith.addf %0, %14 : vector<8x128xf32>
    %c0_8 = arith.constant 0 : index
    %c0_9 = arith.constant 0 : index
    %16 = vector.load %arg4[%c0_8, %c0_9] : memref<8x128xf32, #tpu.memory_space<vmem>>, vector<8x128xf32>
    tpu.vector_store %arg4[%c0_8, %c0_9], %15 {strides = array<i32>} : memref<8x128xf32, #tpu.memory_space<vmem>>, vector<8x128xf32>,
    return
  }
  func.func @transform_0(%arg0: i32) -> (i32, i32) {
    %c0_i32 = arith.constant 0 : i32
    %c0_i32_0 = arith.constant 0 : i32
    return %arg0, %c0_i32 : i32, i32
  }
  func.func @transform_1(%arg0: i32) -> (i32, i32) {
    %c0_i32 = arith.constant 0 : i32
    %c0_i32_0 = arith.constant 0 : i32
    %c0_i32_1 = arith.constant 0 : i32
    return %c0_i32, %c0_i32_0 : i32, i32
  }
  func.func @transform_2(%arg0: i32) -> (i32, i32) {
    %c0_i32 = arith.constant 0 : i32
    %c0_i32_0 = arith.constant 0 : i32
    %c0_i32_1 = arith.constant 0 : i32
    return %c0_i32, %c0_i32_0 : i32, i32
  }
  func.func @transform_3(%arg0: i32) -> (i32, i32) {
    %c0_i32 = arith.constant 0 : i32
    %c0_i32_0 = arith.constant 0 : i32
    return %arg0, %c0_i32 : i32, i32
  }
}

module attributes {stable_mosaic.version = 11 : i64} {
  func.func @_kernel_resident(%arg0: i32, %arg1: memref<8x128xf32, #tpu.memory_space<vmem>>, %arg2: memref<128x128xbf16, #tpu.memory_space<vmem>>, %arg3: memref<1x128xf32, #tpu.memory_space<vmem>>, %arg4: memref<8x128xf32, #tpu.memory_space<vmem>>) attributes {dimension_semantics = [#tpu.dimension_semantics<parallel>], iteration_bounds = array<i64: 1>, scalar_prefetch = 0 : i64, scratch_operands = 0 : i64, tpu.core_type = #tpu.core_type<tc>, window_params = [{transform_indices = @transform_0, window_bounds = array<i64: 8, 128>}, {pipeline_mode = #tpu.pipeline_mode<synchronous>, transform_indices = @transform_1, window_bounds = array<i64: 128, 128>}, {pipeline_mode = #tpu.pipeline_mode<synchronous>, transform_indices = @transform_2, window_bounds = array<i64: 1, 128>}, {transform_indices = @transform_3, window_bounds = array<i64: 8, 128>}]} {
    %c0 = arith.constant 0 : index
    %c0_0 = arith.constant 0 : index
    %0 = vector.load %arg1[%c0, %c0_0] : memref<8x128xf32, #tpu.memory_space<vmem>>, vector<8x128xf32>
    %1 = arith.truncf %0 : vector<8x128xf32> to vector<8x128xbf16>
    %c0_1 = arith.constant 0 : index
    %c0_2 = arith.constant 0 : index
    %2 = vector.load %arg2[%c0_1, %c0_2] : memref<128x128xbf16, #tpu.memory_space<vmem>>, vector<128x128xbf16>
    %cst = arith.constant dense<0.000000e+00> : vector<8x128xf32>
    %3 = tpu.matmul %1, %2, %cst {dimension_numbers = #tpu.dot_dimension_numbers<[1], [0], [0], [1], [0, 0, 1, 1], [], []>} : vector<8x128xbf16>, vector<128x128xbf16>, vector<8x128xf32> -> vector<8x128xf32>
    %c0_3 = arith.constant 0 : index
    %c0_4 = arith.constant 0 : index
    %4 = vector.load %arg3[%c0_3, %c0_4] : memref<1x128xf32, #tpu.memory_space<vmem>>, vector<1x128xf32>
    %5 = vector.broadcast %4 : vector<1x128xf32> to vector<8x128xf32>
    %6 = arith.addf %3, %5 : vector<8x128xf32>
    %cst_5 = arith.constant 5.000000e-01 : f32
    %7 = vector.broadcast %cst_5 : f32 to vector<8x128xf32>
    %8 = arith.mulf %7, %6 : vector<8x128xf32>
    %cst_6 = arith.constant 0.707106769 : f32
    %9 = vector.broadcast %cst_6 : f32 to vector<8x128xf32>
    %10 = arith.mulf %6, %9 : vector<8x128xf32>
    %11 = math.erf %10 : vector<8x128xf32>
    %cst_7 = arith.constant 1.000000e+00 : f32
    %12 = vector.broadcast %cst_7 : f32 to vector<8x128xf32>
    %13 = arith.addf %12, %11 : vector<8x128xf32>
    %14 = arith.mulf %8, %13 : vector<8x128xf32>
    %15 = arith.addf %0, %14 : vector<8x128xf32>
    %c0_8 = arith.constant 0 : index
    %c0_9 = arith.constant 0 : index
    %16 = vector.load %arg4[%c0_8, %c0_9] : memref<8x128xf32, #tpu.memory_space<vmem>>, vector<8x128xf32>
    tpu.vector_store %arg4[%c0_8, %c0_9], %15 {strides = array<i32>} : memref<8x128xf32, #tpu.memory_space<vmem>>, vector<8x128xf32>,
    return
  }
  func.func @transform_0(%arg0: i32) -> (i32, i32) {
    %c0_i32 = arith.constant 0 : i32
    %c0_i32_0 = arith.constant 0 : i32
    return %arg0, %c0_i32 : i32, i32
  }
  func.func @transform_1(%arg0: i32) -> (i32, i32) {
    %c0_i32 = arith.constant 0 : i32
    %c0_i32_0 = arith.constant 0 : i32
    %c0_i32_1 = arith.constant 0 : i32
    return %c0_i32, %c0_i32_0 : i32, i32
  }
  func.func @transform_2(%arg0: i32) -> (i32, i32) {
    %c0_i32 = arith.constant 0 : i32
    %c0_i32_0 = arith.constant 0 : i32
    %c0_i32_1 = arith.constant 0 : i32
    return %c0_i32, %c0_i32_0 : i32, i32
  }
  func.func @transform_3(%arg0: i32) -> (i32, i32) {
    %c0_i32 = arith.constant 0 : i32
    %c0_i32_0 = arith.constant 0 : i32
    return %arg0, %c0_i32 : i32, i32
  }
}

</mosaic_0001>

<bundles_post_ra>
// kernel: tpu_custom_call.1
= control target key start
LH: loop header
LB: loop body
LE: loop exit
PB: predicated region body
PF: predicated region fallthrough
CT: control target
= control target key end

     0   :  { %8 = vsyncpa [#allocation3], 0  ;;  %s338_s0 = inlined_call_operand.hbm [shape: f32[8,128], index: 0, kind: input, shape index: {}]   ;;  %s339_s1 = inlined_call_operand.hbm [shape: bf16[128,128], index: 1, kind: input, shape index: {}]   ;;  %s340_s2 = inlined_call_operand.vmem [shape: f32[1,128], index: 2, kind: input, shape index: {}]   ;;  %s341_s3 = inlined_call_operand.hbm [shape: f32[8,128], index: 3, kind: output, shape index: {}]  }
   0x1   :  { %9 = vsyncpa [#allocation6], 0 }
   0x2   :  { %10 = vsyncpa [#allocation4], 0  ;;  %s299_s12 = smov [#allocation2]   ;;  %s300_s14 = smov [#allocation5]  }
   0x3   :  { %s17_s13 = sshll.u32 %s299_s12, 4  ;;  %s26_s15 = sshll.u32 %s300_s14, 4  ;;  %s18_s13 = int_to_ptr.vmem [resolvable:$true] %s17_s13  ;;  %s27_s15 = int_to_ptr.vmem [resolvable:$true] %s26_s15 }
   0x4   :  { %s241_s16 = scalar_lea.vmem %s18_s13, 128  ;;  %p246_p1 = scmp.lt.s32.totalorder %s18_s13, %s18_s13 }
   0x5   :  { %p242_p0 = scmp.ne.s32.totalorder %s18_s13, %s241_s16  ;;  %p247_p2 = scmp.lt.s32.totalorder %s241_s16, %s241_s16 }
   0x7   :  { %p248_p3 = por %p247_p2, %p246_p1 }
   0x9   :  { %p249_p4 = pnand %p248_p3, %p242_p0 }
   0xb   :  { %252 = shalt.err (!%p249_p4)
}
   0xc   :  { %20 = dma.hbm_to_vmem [thread:$0]  %s338_s0, 128, %s18_s13, [#allocation3]  }
   0xd   :  { %s261_s19 = scalar_lea.vmem %s27_s15, 1024  ;;  %p266_p6 = scmp.lt.s32.totalorder %s27_s15, %s27_s15 }
   0xe   :  { %p262_p5 = scmp.ne.s32.totalorder %s27_s15, %s261_s19  ;;  %p267_p7 = scmp.lt.s32.totalorder %s261_s19, %s261_s19 }
  0x10   :  { %p268_p8 = por %p267_p7, %p266_p6 }
  0x12   :  { %p269_p9 = pnand %p268_p8, %p262_p5 }
  0x14   :  { %272 = shalt.err (!%p269_p9)
}
  0x15   :  { %s301_s20 = smov 64   ;;  %s302_s21 = smov 4  }
  0x16   :  { %32 = dma.hbm_to_vmem [thread:$0]  %s339_s1, 1024, %s27_s15, [#allocation6], %s301_s20, %s301_s20, %s302_s21  }
  0x17   :  { %293 = dma.done.wait [#allocation3], 128  }
  0x18   :  { %294 = vsyncadd [#allocation3], 4294967168 }
  0x19   :  { %295 = dma.done.wait [#allocation6], 1024  }
  0x1a   :  { %296 = vsyncadd [#allocation6], 4294966272  ;;  %v303_v0 = vmov 0.0   ;;  %vm304_vm0 = vmmov 0   ;;  %v223_v1 = vld [vmem:[#allocation5 + $0x38] sm:$0xff]   ;;  %v224_v2 = vld [vmem:[#allocation5 + $0x30] sm:$0xff]  }
  0x1b   :  { %196 = vmatprep.subr.bf16.mxu0 %v303_v0  ;;  %212 = vmatprep.mubr.msk.bf16.mxu0 %vm304_vm0, %v303_v0  ;;  %v225_v3 = vld [vmem:[#allocation5 + $0x28] sm:$0xff]   ;;  %v226_v4 = vld [vmem:[#allocation5 + $0x20] sm:$0xff]   ;;  %v227_v5 = vld [vmem:[#allocation5 + $0x18] sm:$0xff]   ;;  %s305_s24 = smov [#allocation7]  }
  0x1c   :  { %197 = vmatpush3.bf16.msra.mxu0 %v223_v1  ;;  %v228_v6 = vld [vmem:[#allocation5 + $0x10] sm:$0xff]   ;;  %v229_v7 = vld [vmem:[#allocation5 + $0x8] sm:$0xff]   ;;  %v230_v8 = vld [vmem:[#allocation5] sm:$0xff]   ;;  %s168_s25 = sshll.u32 %s305_s24, 4  ;;  %s169_s25 = int_to_ptr.vmem [resolvable:$true] %s168_s25 }
  0x1d   :  { %198 = vmatprep.subr.bf16.mxu0 %v303_v0  ;;  %v42_v9 = vld [vmem:[#allocation2] sm:$0xff]  ;;  %s273_s26 = scalar_lea.vmem %s169_s25, 128  ;;  %p278_p11 = scmp.lt.s32.totalorder %s169_s25, %s169_s25 }
  0x1e   :  { %v43_v10 = vpack.c.bf16 %v42_v9, %v42_v9  ;;  %v178_v11 = vld [vmem:[%s340_s2] ss:$0 sm:$0xff]  ;;  %p274_p10 = scmp.ne.s32.totalorder %s169_s25, %s273_s26  ;;  %p279_p12 = scmp.lt.s32.totalorder %s273_s26, %s273_s26 }
  0x20   :  { %199 = vmatpush3.bf16.msra.mxu0 %v224_v2  ;;  %p280_p13 = por %p279_p12, %p278_p11 }
  0x21   :  { %200 = vmatprep.subr.bf16.mxu0 %v303_v0 }
  0x22   :  { %p281_p0 = pnand %p280_p13, %p274_p10 }
  0x24   :  { %201 = vmatpush3.bf16.msra.mxu0 %v225_v3 }
  0x25   :  { %202 = vmatprep.subr.bf16.mxu0 %v303_v0 }
  0x28   :  { %203 = vmatpush3.bf16.msra.mxu0 %v226_v4 }
  0x29   :  { %204 = vmatprep.subr.bf16.mxu0 %v303_v0 }
  0x2c   :  { %205 = vmatpush3.bf16.msra.mxu0 %v227_v5 }
  0x2d   :  { %206 = vmatprep.subr.bf16.mxu0 %v303_v0 }
  0x30   :  { %207 = vmatpush3.bf16.msra.mxu0 %v228_v6 }
  0x31   :  { %208 = vmatprep.subr.bf16.mxu0 %v303_v0 }
  0x34   :  { %209 = vmatpush3.bf16.msra.mxu0 %v229_v7 }
  0x35   :  { %210 = vmatprep.subr.bf16.mxu0 %v303_v0 }
  0x38   :  { %211 = vmatpush3.bf16.msra.mxu0 %v230_v8 }
  0x3b   :  { %213 = vmatmul.mubr.bf16.vlgmr.msra.gmra.mxu0 %v43_v10 }
  0xfb   :  { %v149_v12 = vpop.f32.mrf.mxu0 }
  0xfc   :  { %v150_v13 = vadd.f32 %v178_v11, %v149_v12 }
  0xfd   :  { %v214_v14 = vpop.f32.mrf.mxu0 }
  0xfe   :  { %v156_v15 = vmul.f32 0.70710677, %v150_v13  ;;  %v155_v19 = vmul.f32 0.5, %v150_v13 }
  0xff   :  { %v152_v16 = vpop.f32.mrf.mxu0 }
 0x100   :  { %231 = verf.f32 %v156_v15 }
 0x101   :  { %v215_v17 = vpop.f32.mrf.mxu0 }
 0x10d   :  { %v232_v18 = vpop.eup %231 }
 0x10e   :  { %v158_v20 = vadd.f32 1.0, %v232_v18 }
 0x110   :  { %v159_v21 = vmul.f32 %v158_v20, %v155_v19 }
 0x112   :  { %v160_v22 = vadd.f32 %v159_v21, %v42_v9 }
 0x114   :  { %161 = vst [vmem:[#allocation7] sm:$0xff] %v160_v22 }
 0x115   :  { %284 = shalt.err (!%p281_p0)
}
 0x116   :  { %171 = dma.vmem_to_hbm [thread:$0]  %s169_s25, 128, %s341_s3, [#allocation4]  }
 0x117   :  { %297 = dma.done.wait [#allocation4], 128  }
 0x118   :  { %298 = vsyncadd [#allocation4], 4294967168 }
 0x119   :  { %175 = vsyncpa [#allocation3], 1 }
 0x11a   :  { %176 = vsyncpa [#allocation6], 1 }
 0x11b   :  { %177 = vsyncpa [#allocation4], 1 }

// kernel: tpu_custom_call.1
= control target key start
LH: loop header
LB: loop body
LE: loop exit
PB: predicated region body
PF: predicated region fallthrough
CT: control target
= control target key end

     0   :  { %8 = vsyncpa [#allocation3], 0  ;;  %s338_s0 = inlined_call_operand.hbm [shape: f32[8,128], index: 0, kind: input, shape index: {}]   ;;  %s339_s1 = inlined_call_operand.hbm [shape: bf16[128,128], index: 1, kind: input, shape index: {}]   ;;  %s340_s2 = inlined_call_operand.vmem [shape: f32[1,128], index: 2, kind: input, shape index: {}]   ;;  %s341_s3 = inlined_call_operand.hbm [shape: f32[8,128], index: 3, kind: output, shape index: {}]  }
   0x1   :  { %9 = vsyncpa [#allocation6], 0 }
   0x2   :  { %10 = vsyncpa [#allocation4], 0  ;;  %s299_s12 = smov [#allocation2]   ;;  %s300_s14 = smov [#allocation5]  }
   0x3   :  { %s17_s13 = sshll.u32 %s299_s12, 4  ;;  %s26_s15 = sshll.u32 %s300_s14, 4  ;;  %s18_s13 = int_to_ptr.vmem [resolvable:$true] %s17_s13  ;;  %s27_s15 = int_to_ptr.vmem [resolvable:$true] %s26_s15 }
   0x4   :  { %s241_s16 = scalar_lea.vmem %s18_s13, 128  ;;  %p246_p1 = scmp.lt.s32.totalorder %s18_s13, %s18_s13 }
   0x5   :  { %p242_p0 = scmp.ne.s32.totalorder %s18_s13, %s241_s16  ;;  %p247_p2 = scmp.lt.s32.totalorder %s241_s16, %s241_s16 }
   0x7   :  { %p248_p3 = por %p247_p2, %p246_p1 }
   0x9   :  { %p249_p4 = pnand %p248_p3, %p242_p0 }
   0xb   :  { %252 = shalt.err (!%p249_p4)
}
   0xc   :  { %20 = dma.hbm_to_vmem [thread:$0]  %s338_s0, 128, %s18_s13, [#allocation3]  }
   0xd   :  { %s261_s19 = scalar_lea.vmem %s27_s15, 1024  ;;  %p266_p6 = scmp.lt.s32.totalorder %s27_s15, %s27_s15 }
   0xe   :  { %p262_p5 = scmp.ne.s32.totalorder %s27_s15, %s261_s19  ;;  %p267_p7 = scmp.lt.s32.totalorder %s261_s19, %s261_s19 }
  0x10   :  { %p268_p8 = por %p267_p7, %p266_p6 }
  0x12   :  { %p269_p9 = pnand %p268_p8, %p262_p5 }
  0x14   :  { %272 = shalt.err (!%p269_p9)
}
  0x15   :  { %s301_s20 = smov 64   ;;  %s302_s21 = smov 4  }
  0x16   :  { %32 = dma.hbm_to_vmem [thread:$0]  %s339_s1, 1024, %s27_s15, [#allocation6], %s301_s20, %s301_s20, %s302_s21  }
  0x17   :  { %293 = dma.done.wait [#allocation3], 128  }
  0x18   :  { %294 = vsyncadd [#allocation3], 4294967168 }
  0x19   :  { %295 = dma.done.wait [#allocation6], 1024  }
  0x1a   :  { %296 = vsyncadd [#allocation6], 4294966272  ;;  %v303_v0 = vmov 0.0   ;;  %vm304_vm0 = vmmov 0   ;;  %v223_v1 = vld [vmem:[#allocation5 + $0x38] sm:$0xff]   ;;  %v224_v2 = vld [vmem:[#allocation5 + $0x30] sm:$0xff]  }
  0x1b   :  { %196 = vmatprep.subr.bf16.mxu0 %v303_v0  ;;  %212 = vmatprep.mubr.msk.bf16.mxu0 %vm304_vm0, %v303_v0  ;;  %v225_v3 = vld [vmem:[#allocation5 + $0x28] sm:$0xff]   ;;  %v226_v4 = vld [vmem:[#allocation5 + $0x20] sm:$0xff]   ;;  %v227_v5 = vld [vmem:[#allocation5 + $0x18] sm:$0xff]   ;;  %s305_s24 = smov [#allocation7]  }
  0x1c   :  { %197 = vmatpush3.bf16.msra.mxu0 %v223_v1  ;;  %v228_v6 = vld [vmem:[#allocation5 + $0x10] sm:$0xff]   ;;  %v229_v7 = vld [vmem:[#allocation5 + $0x8] sm:$0xff]   ;;  %v230_v8 = vld [vmem:[#allocation5] sm:$0xff]   ;;  %s168_s25 = sshll.u32 %s305_s24, 4  ;;  %s169_s25 = int_to_ptr.vmem [resolvable:$true] %s168_s25 }
  0x1d   :  { %198 = vmatprep.subr.bf16.mxu0 %v303_v0  ;;  %v42_v9 = vld [vmem:[#allocation2] sm:$0xff]  ;;  %s273_s26 = scalar_lea.vmem %s169_s25, 128  ;;  %p278_p11 = scmp.lt.s32.totalorder %s169_s25, %s169_s25 }
  0x1e   :  { %v43_v10 = vpack.c.bf16 %v42_v9, %v42_v9  ;;  %v178_v11 = vld [vmem:[%s340_s2] ss:$0 sm:$0xff]  ;;  %p274_p10 = scmp.ne.s32.totalorder %s169_s25, %s273_s26  ;;  %p279_p12 = scmp.lt.s32.totalorder %s273_s26, %s273_s26 }
  0x20   :  { %199 = vmatpush3.bf16.msra.mxu0 %v224_v2  ;;  %p280_p13 = por %p279_p12, %p278_p11 }
  0x21   :  { %200 = vmatprep.subr.bf16.mxu0 %v303_v0 }
  0x22   :  { %p281_p0 = pnand %p280_p13, %p274_p10 }
  0x24   :  { %201 = vmatpush3.bf16.msra.mxu0 %v225_v3 }
  0x25   :  { %202 = vmatprep.subr.bf16.mxu0 %v303_v0 }
  0x28   :  { %203 = vmatpush3.bf16.msra.mxu0 %v226_v4 }
  0x29   :  { %204 = vmatprep.subr.bf16.mxu0 %v303_v0 }
  0x2c   :  { %205 = vmatpush3.bf16.msra.mxu0 %v227_v5 }
  0x2d   :  { %206 = vmatprep.subr.bf16.mxu0 %v303_v0 }
  0x30   :  { %207 = vmatpush3.bf16.msra.mxu0 %v228_v6 }
  0x31   :  { %208 = vmatprep.subr.bf16.mxu0 %v303_v0 }
  0x34   :  { %209 = vmatpush3.bf16.msra.mxu0 %v229_v7 }
  0x35   :  { %210 = vmatprep.subr.bf16.mxu0 %v303_v0 }
  0x38   :  { %211 = vmatpush3.bf16.msra.mxu0 %v230_v8 }
  0x3b   :  { %213 = vmatmul.mubr.bf16.vlgmr.msra.gmra.mxu0 %v43_v10 }
  0xfb   :  { %v149_v12 = vpop.f32.mrf.mxu0 }
  0xfc   :  { %v150_v13 = vadd.f32 %v178_v11, %v149_v12 }
  0xfd   :  { %v214_v14 = vpop.f32.mrf.mxu0 }
  0xfe   :  { %v156_v15 = vmul.f32 0.70710677, %v150_v13  ;;  %v155_v19 = vmul.f32 0.5, %v150_v13 }
  0xff   :  { %v152_v16 = vpop.f32.mrf.mxu0 }
 0x100   :  { %231 = verf.f32 %v156_v15 }
 0x101   :  { %v215_v17 = vpop.f32.mrf.mxu0 }
 0x10d   :  { %v232_v18 = vpop.eup %231 }
 0x10e   :  { %v158_v20 = vadd.f32 1.0, %v232_v18 }
 0x110   :  { %v159_v21 = vmul.f32 %v158_v20, %v155_v19 }
 0x112   :  { %v160_v22 = vadd.f32 %v159_v21, %v42_v9 }
 0x114   :  { %161 = vst [vmem:[#allocation7] sm:$0xff] %v160_v22 }
 0x115   :  { %284 = shalt.err (!%p281_p0)
}
 0x116   :  { %171 = dma.vmem_to_hbm [thread:$0]  %s169_s25, 128, %s341_s3, [#allocation4]  }
 0x117   :  { %297 = dma.done.wait [#allocation4], 128  }
 0x118   :  { %298 = vsyncadd [#allocation4], 4294967168 }
 0x119   :  { %175 = vsyncpa [#allocation3], 1 }
 0x11a   :  { %176 = vsyncpa [#allocation6], 1 }
 0x11b   :  { %177 = vsyncpa [#allocation4], 1 }

</bundles_post_ra>
